<compile_context>
chip_gen: v7x
topology: tpu7x:2x2x1
jax: 0.10.0
libtpu: 0.0.40
codegen_flags: <defaults>
</compile_context>

<pallas_src>
import jax
import jax.numpy as jnp
from jax.experimental import pallas as pl
from jax.experimental.pallas import tpu as pltpu


def _vmem():
    """Full-array block resident in VMEM (no grid, no pipelining)."""
    return pl.BlockSpec(memory_space=pltpu.MemorySpace.VMEM)


# ----------------------------------------------------------------------------
# Pallas kernels
# ----------------------------------------------------------------------------
def _mlp2_kernel(x_ref, w1_ref, b1_ref, w2_ref, b2_ref, o_ref):
    """2-layer MLP (whole batch, one invocation): ReLU(x @ W1 + b1) @ W2 + b2."""
    h = jnp.dot(x_ref[...], w1_ref[...], preferred_element_type=jnp.float32) + b1_ref[...]
    h = jnp.maximum(h, 0.0)
    o = jnp.dot(h, w2_ref[...], preferred_element_type=jnp.float32) + b2_ref[...]
    o_ref[...] = o.astype(o_ref.dtype)


def _attn_kernel(g_ref, n_ref, wg_ref, bg_ref, wn_ref, bn_ref, o_ref):
    """NodeGraphAttn, whole batch in one invocation.

    g_ref: (B, Dg)      graph features
    n_ref: (B*N, Dn)    node features flattened over (batch, node)
    o_ref: (B, N)       scores (node index on lanes — single lane-dense store)
    """
    B = g_ref.shape[0]
    N = o_ref.shape[1]
    H = wg_ref.shape[1]
    # One batched matmul per projection (MXU), f32 accumulation.
    g_proj = jnp.dot(g_ref[...], wg_ref[...], preferred_element_type=jnp.float32) + bg_ref[...]   # (B, H)
    n_proj = jnp.dot(n_ref[...], wn_ref[...], preferred_element_type=jnp.float32) + bn_ref[...]   # (B*N, H)
    # scores[b, n] = <n_proj[b, n, :], g_proj[b, :]>  — VPU multiply + cross-lane
    # reduce over H (keeps the tiny contraction off the MXU result FIFO).
    scores = jnp.sum(n_proj.reshape(B, N, H) * g_proj[:, None, :], axis=-1)                       # (B, N)
    o_ref[...] = scores.astype(o_ref.dtype)


# ----------------------------------------------------------------------------
# Wrappers (pallas_call plumbing)
# ----------------------------------------------------------------------------
def mlp2(x, w1, b1, w2, b2):
    """Single-invocation 2-layer MLP (no grid, full-array VMEM blocks)."""
    B = x.shape[0]
    Dout = w2.shape[1]
    return pl.pallas_call(
        _mlp2_kernel,
        out_shape=jax.ShapeDtypeStruct((B, Dout), x.dtype),
        in_specs=[_vmem() for _ in range(5)],
        out_specs=_vmem(),
    )(x, w1, b1, w2, b2)


def actor_critic_fused(x, w1, b1, w2, b2, action_dim):
    """Fused actor+critic: one launch, 2 matmuls, one (B, A+C) store, split in wrapper."""
    out = mlp2(x, w1, b1, w2, b2)              # (B, A + C)
    return out[:, :action_dim], out[:, action_dim:]


def node_graph_attn(g_feats, n_feats, wg, bg, wn, bn):
    """g_feats: (B, Dg), n_feats: (B, N, Dn) -> scores (B, N). One launch."""
    B, N, Dn = n_feats.shape
    Hg, Hn = wg.shape[1], wn.shape[1]
    assert Hg == Hn, "NodeGraphAttn requires node/graph projections with equal hidden size"
    # Pad node count to a sublane multiple so the in-kernel (B*N, H) -> (B, N, H)
    # reshape is tile-aligned; padded scores are sliced off in the wrapper.
    n_pad = max(8, ((N + 7) // 8) * 8)
    if n_pad != N:
        n_feats = jnp.pad(n_feats, ((0, 0), (0, n_pad - N), (0, 0)))
    n2 = n_feats.reshape(B * n_pad, Dn)        # contiguous reshape in the wrapper (free)
    scores = pl.pallas_call(
        _attn_kernel,
        out_shape=jax.ShapeDtypeStruct((B, n_pad), g_feats.dtype),
        in_specs=[_vmem() for _ in range(6)],
        out_specs=_vmem(),
    )(g_feats, n2, wg, bg, wn, bn)
    return scores if n_pad == N else scores[:, :N]


# ----------------------------------------------------------------------------
# Module
# ----------------------------------------------------------------------------
class NonHirActorCriticPallas:
    def __init__(self, key, gnn_output_dim=32, actor_hidden_size=32,
                 critic_hidden_size=32, action_dim=32):
        ks = jax.random.split(key, 6)

        def linear(k, fan_in, fan_out):
            # PyTorch-Linear-like init: U(-1/sqrt(fan_in), 1/sqrt(fan_in))
            kw, kb = jax.random.split(k)
            bound = 1.0 / float(fan_in) ** 0.5
            w = jax.random.uniform(kw, (fan_out, fan_in), jnp.float32, -bound, bound)
            b = jax.random.uniform(kb, (fan_out,), jnp.float32, -bound, bound)
            return w.T, b.reshape(1, fan_out)  # kernel layout

        self.action_dim = action_dim

        # actor: MLP(2, gnn_output_dim, actor_hidden_size, action_dim)
        self.actor_w1, self.actor_b1 = linear(ks[0], gnn_output_dim, actor_hidden_size)
        self.actor_w2, self.actor_b2 = linear(ks[1], actor_hidden_size, action_dim)
        # critic: MLP(2, gnn_output_dim, critic_hidden_size, 1)
        self.critic_w1, self.critic_b1 = linear(ks[2], gnn_output_dim, critic_hidden_size)
        self.critic_w2, self.critic_b2 = linear(ks[3], critic_hidden_size, 1)
        # attn: NodeGraphAttn(gnn_output_dim, gnn_output_dim, gnn_output_dim)
        self.attn_wn, self.attn_bn = linear(ks[4], gnn_output_dim, gnn_output_dim)
        self.attn_wg, self.attn_bg = linear(ks[5], gnn_output_dim, gnn_output_dim)

        # Pre-merged actor|critic weights (built once at init, not per call):
        #   layer-1 weights concatenated on the output dim, layer-2 block-diagonal,
        #   so the fused head is a single 2-matmul MLP with a lane-merged output.
        ha = actor_hidden_size
        a = action_dim
        c = self.critic_w2.shape[1]
        self.ac_w1 = jnp.concatenate([self.actor_w1, self.critic_w1], axis=1)   # (Din, Ha+Hc)
        self.ac_b1 = jnp.concatenate([self.actor_b1, self.critic_b1], axis=1)   # (1, Ha+Hc)
        w2 = jnp.zeros((ha + critic_hidden_size, a + c), jnp.float32)
        w2 = w2.at[:ha, :a].set(self.actor_w2)
        w2 = w2.at[ha:, a:].set(self.critic_w2)
        self.ac_w2 = w2                                                          # (Ha+Hc, A+C)
        self.ac_b2 = jnp.concatenate([self.actor_b2, self.critic_b2], axis=1)    # (1, A+C)

    def forward(self, x, callee):
        if callee == "actor":
            return mlp2(x, self.actor_w1, self.actor_b1, self.actor_w2, self.actor_b2)
        elif callee == "critic":
            return mlp2(x, self.critic_w1, self.critic_b1, self.critic_w2, self.critic_b2)
        elif callee == "attn":
            g_feats, n_feats = x
            return node_graph_attn(g_feats, n_feats,
                                   self.attn_wg, self.attn_bg,
                                   self.attn_wn, self.attn_bn)
        elif callee == "gnn":
            # TODO(synk): QGIN/QGNN message passing over DGL sparse graphs is not defined
            # in the provided source; not implemented as a Pallas kernel.
            raise NotImplementedError("gnn callee not implemented")
        else:
            raise NotImplementedError(f"Unexpected callee name: {callee}")

    def forward_actor_critic(self, x):
        """Fused evaluation of both heads on the same activations (one launch, 2 matmuls)."""
        return actor_critic_fused(x, self.ac_w1, self.ac_b1, self.ac_w2, self.ac_b2,
                                  self.action_dim)


# ----------------------------------------------------------------------------
# Pure-JAX references (sanity checks)
# ----------------------------------------------------------------------------
def _ref_mlp2(x, w1, b1, w2, b2):
    h = jnp.maximum(x @ w1 + b1, 0.0)
    return h @ w2 + b2


def _ref_attn(g_feats, n_feats, wg, bg, wn, bn):
    g = g_feats @ wg + bg[0]                 # (B, H)
    n = n_feats @ wn + bn[0]                 # (B, N, H)
    return jnp.einsum("bnh,bh->bn", n, g)    # (B, N)


if __name__ == "__main__":
    key = jax.random.PRNGKey(0)
    k_model, k_actor, k_g, k_n, k_odd, k_g2, k_n2 = jax.random.split(key, 7)

    model = NonHirActorCriticPallas(k_model)

    # actor / critic inputs: (B, gnn_output_dim)
    B_ac, D = 16, 32
    x_ac = jax.random.normal(k_actor, (B_ac, D), jnp.float32)

    # attn inputs: g_feats (B, D), n_feats (B, num_nodes, D)
    B_attn, N = 8, 16
    g_feats = jax.random.normal(k_g, (B_attn, D), jnp.float32)
    n_feats = jax.random.normal(k_n, (B_attn, N, D), jnp.float32)

    actor_out = jax.block_until_ready(model.forward(x_ac, "actor"))
    critic_out = jax.block_until_ready(model.forward(x_ac, "critic"))
    attn_out = jax.block_until_ready(model.forward((g_feats, n_feats), "attn"))
    fused_actor, fused_critic = jax.block_until_ready(model.forward_actor_critic(x_ac))

    assert actor_out.shape == (B_ac, 32)
    assert critic_out.shape == (B_ac, 1)
    assert attn_out.shape == (B_attn, N)
    assert fused_actor.shape == (B_ac, 32)
    assert fused_critic.shape == (B_ac, 1)

    # numerics vs. pure-JAX references (tightened from 2e-2)
    RTOL = ATOL = 5e-3
    ref_actor = _ref_mlp2(x_ac, model.actor_w1, model.actor_b1, model.actor_w2, model.actor_b2)
    ref_critic = _ref_mlp2(x_ac, model.critic_w1, model.critic_b1, model.critic_w2, model.critic_b2)
    ref_attn = _ref_attn(g_feats, n_feats, model.attn_wg, model.attn_bg, model.attn_wn, model.attn_bn)

    assert jnp.allclose(actor_out, ref_actor, rtol=RTOL, atol=ATOL)
    assert jnp.allclose(critic_out, ref_critic, rtol=RTOL, atol=ATOL)
    assert jnp.allclose(attn_out, ref_attn, rtol=RTOL, atol=ATOL)
    assert jnp.allclose(fused_actor, ref_actor, rtol=RTOL, atol=ATOL)
    assert jnp.allclose(fused_critic, ref_critic, rtol=RTOL, atol=ATOL)

    # robustness: odd batch size (not a multiple of 8) works with full-array blocks
    x_odd = jax.random.normal(k_odd, (10, D), jnp.float32)
    odd_out = jax.block_until_ready(model.forward(x_odd, "actor"))
    ref_odd = _ref_mlp2(x_odd, model.actor_w1, model.actor_b1, model.actor_w2, model.actor_b2)
    assert odd_out.shape == (10, 32)
    assert jnp.allclose(odd_out, ref_odd, rtol=RTOL, atol=ATOL)

    # robustness: odd node count / odd batch for attention (exercises node padding path)
    g_odd = jax.random.normal(k_g2, (5, D), jnp.float32)
    n_odd = jax.random.normal(k_n2, (5, 12, D), jnp.float32)
    attn_odd = jax.block_until_ready(model.forward((g_odd, n_odd), "attn"))
    ref_attn_odd = _ref_attn(g_odd, n_odd, model.attn_wg, model.attn_bg, model.attn_wn, model.attn_bn)
    assert attn_odd.shape == (5, 12)
    assert jnp.allclose(attn_odd, ref_attn_odd, rtol=RTOL, atol=ATOL)

    print("KERNEL_OK")
</pallas_src>

<mosaic_0001>
module attributes {stable_mosaic.version = 11 : i64} {
  func.func @_mlp2_kernel(%arg0: memref<16x32xf32, #tpu.memory_space<vmem>>, %arg1: memref<32x32xf32, #tpu.memory_space<vmem>>, %arg2: memref<1x32xf32, #tpu.memory_space<vmem>>, %arg3: memref<32x32xf32, #tpu.memory_space<vmem>>, %arg4: memref<1x32xf32, #tpu.memory_space<vmem>>, %arg5: memref<16x32xf32, #tpu.memory_space<vmem>>) attributes {dimension_semantics = [], scalar_prefetch = 0 : i64, scratch_operands = 0 : i64, tpu.core_type = #tpu.core_type<tc>} {
    %c0 = arith.constant 0 : index
    %c0_0 = arith.constant 0 : index
    %0 = vector.load %arg0[%c0, %c0_0] : memref<16x32xf32, #tpu.memory_space<vmem>>, vector<16x32xf32>
    %c0_1 = arith.constant 0 : index
    %c0_2 = arith.constant 0 : index
    %1 = vector.load %arg1[%c0_1, %c0_2] : memref<32x32xf32, #tpu.memory_space<vmem>>, vector<32x32xf32>
    %cst = arith.constant dense<0.000000e+00> : vector<16x32xf32>
    %2 = tpu.matmul %0, %1, %cst {dimension_numbers = #tpu.dot_dimension_numbers<[1], [0], [0], [1], [0, 0, 1, 1], [], []>} : vector<16x32xf32>, vector<32x32xf32>, vector<16x32xf32> -> vector<16x32xf32>
    %c0_3 = arith.constant 0 : index
    %c0_4 = arith.constant 0 : index
    %3 = vector.load %arg2[%c0_3, %c0_4] : memref<1x32xf32, #tpu.memory_space<vmem>>, vector<1x32xf32>
    %4 = vector.broadcast %3 : vector<1x32xf32> to vector<16x32xf32>
    %5 = arith.addf %2, %4 : vector<16x32xf32>
    %cst_5 = arith.constant 0.000000e+00 : f32
    %6 = vector.broadcast %cst_5 : f32 to vector<16x32xf32>
    %7 = arith.maximumf %5, %6 : vector<16x32xf32>
    %c0_6 = arith.constant 0 : index
    %c0_7 = arith.constant 0 : index
    %8 = vector.load %arg3[%c0_6, %c0_7] : memref<32x32xf32, #tpu.memory_space<vmem>>, vector<32x32xf32>
    %cst_8 = arith.constant dense<0.000000e+00> : vector<16x32xf32>
    %9 = tpu.matmul %7, %8, %cst_8 {dimension_numbers = #tpu.dot_dimension_numbers<[1], [0], [0], [1], [0, 0, 1, 1], [], []>} : vector<16x32xf32>, vector<32x32xf32>, vector<16x32xf32> -> vector<16x32xf32>
    %c0_9 = arith.constant 0 : index
    %c0_10 = arith.constant 0 : index
    %10 = vector.load %arg4[%c0_9, %c0_10] : memref<1x32xf32, #tpu.memory_space<vmem>>, vector<1x32xf32>
    %11 = vector.broadcast %10 : vector<1x32xf32> to vector<16x32xf32>
    %12 = arith.addf %9, %11 : vector<16x32xf32>
    %c0_11 = arith.constant 0 : index
    %c0_12 = arith.constant 0 : index
    %13 = vector.load %arg5[%c0_11, %c0_12] : memref<16x32xf32, #tpu.memory_space<vmem>>, vector<16x32xf32>
    tpu.vector_store %arg5[%c0_11, %c0_12], %12 {strides = array<i32>} : memref<16x32xf32, #tpu.memory_space<vmem>>, vector<16x32xf32>,
    return
  }
}

</mosaic_0001>

<bundles_post_ra>
// kernel: tpu_custom_call.1
= control target key start
LH: loop header
LB: loop body
LE: loop exit
PB: predicated region body
PF: predicated region fallthrough
CT: control target
= control target key end

     0   :  { %10 = vsyncpa [#allocation3], 0  ;;  %s542_s0 = inlined_call_operand.hbm [shape: f32[16,32], index: 0, kind: input, shape index: {}]   ;;  %s543_s1 = inlined_call_operand.hbm [shape: f32[32,32], index: 1, kind: input, shape index: {}]   ;;  %s544_s2 = inlined_call_operand.vmem [shape: f32[1,32], index: 2, kind: input, shape index: {}]   ;;  %s545_s3 = inlined_call_operand.hbm [shape: f32[32,32], index: 3, kind: input, shape index: {}]   ;;  %s546_s4 = inlined_call_operand.vmem [shape: f32[1,32], index: 4, kind: input, shape index: {}]   ;;  %s547_s5 = inlined_call_operand.hbm [shape: f32[16,32], index: 5, kind: output, shape index: {}]  }
   0x1   :  { %11 = vsyncpa [#allocation6], 0 }
   0x2   :  { %12 = vsyncpa [#allocation4], 0  ;;  %s427_s18 = smov [#allocation5]   ;;  %s428_s20 = smov [#allocation2]  }
   0x3   :  { %s30_s19 = sshll.u32 %s427_s18, 4  ;;  %s18_s21 = sshll.u32 %s428_s20, 4  ;;  %s31_s19 = int_to_ptr.vmem [resolvable:$true] %s30_s19  ;;  %s463_s21 = int_to_ptr.vmem [resolvable:$true] %s18_s21 }
   0x4   :  { %s333_s24 = scalar_lea.hbm %s543_s1, 512 }
   0x5   :  { %p334_p0 = scmp.ne.s32.totalorder %s543_s1, %s333_s24  ;;  %p337_p1 = scmp.lt.u32.totalorder %s333_s24, %s543_s1 }
   0x7   :  { %p339_p2 = pnand %p337_p1, %p334_p0 }
   0x9   :  { %342 = shalt.err (!%p339_p2)
}
   0xa   :  { %s343_s29 = scalar_lea.vmem %s31_s19, 512  ;;  %p348_p4 = scmp.lt.s32.totalorder %s31_s19, %s31_s19 }
   0xb   :  { %p344_p3 = scmp.ne.s32.totalorder %s31_s19, %s343_s29  ;;  %p349_p5 = scmp.lt.s32.totalorder %s343_s29, %s343_s29 }
   0xd   :  { %p350_p6 = por %p349_p5, %p348_p4 }
   0xf   :  { %p351_p7 = pnand %p350_p6, %p344_p3 }
  0x11   :  { %354 = shalt.err (!%p351_p7)
}
  0x12   :  { %s429_s30 = smov 128   ;;  %s430_s6 = smov 8  }
  0x13   :  { %36 = dma.hbm_to_vmem [thread:$0]  %s543_s1, 512, %s31_s19, [#allocation6], %s429_s30, %s429_s30, %s430_s6  }
  0x14   :  { %s355_s11 = scalar_lea.hbm %s542_s0, 256 }
  0x15   :  { %p356_p8 = scmp.ne.s32.totalorder %s542_s0, %s355_s11  ;;  %p359_p9 = scmp.lt.u32.totalorder %s355_s11, %s542_s0 }
  0x17   :  { %p361_p10 = pnand %p359_p9, %p356_p8 }
  0x19   :  { %364 = shalt.err (!%p361_p10)
}
  0x1a   :  { %s365_s16 = scalar_lea.vmem %s463_s21, 256  ;;  %p370_p12 = scmp.lt.s32.totalorder %s463_s21, %s463_s21 }
  0x1b   :  { %p366_p11 = scmp.ne.s32.totalorder %s463_s21, %s365_s16  ;;  %p371_p13 = scmp.lt.s32.totalorder %s365_s16, %s365_s16 }
  0x1d   :  { %p372_p0 = por %p371_p13, %p370_p12 }
  0x1f   :  { %p373_p1 = pnand %p372_p0, %p366_p11 }
  0x21   :  { %376 = shalt.err (!%p373_p1)
}
  0x22   :  { %24 = dma.hbm_to_vmem [thread:$0]  %s542_s0, 256, %s463_s21, [#allocation3], %s429_s30, %s429_s30, %s430_s6  }
  0x23   :  { %s431_s18 = smov [#allocation7]   ;;  %s377_s23 = scalar_lea.hbm %s545_s3, 512 }
  0x24   :  { %s44_s19 = sshll.u32 %s431_s18, 4  ;;  %p378_p2 = scmp.ne.s32.totalorder %s545_s3, %s377_s23  ;;  %s45_s19 = int_to_ptr.vmem [resolvable:$true] %s44_s19 }
  0x25   :  { %p381_p3 = scmp.lt.u32.totalorder %s377_s23, %s545_s3 }
  0x27   :  { %p383_p4 = pnand %p381_p3, %p378_p2 }
  0x29   :  { %386 = shalt.err (!%p383_p4)
}
  0x2a   :  { %s387_s28 = scalar_lea.vmem %s45_s19, 512  ;;  %p392_p6 = scmp.lt.s32.totalorder %s45_s19, %s45_s19 }
  0x2b   :  { %p388_p5 = scmp.ne.s32.totalorder %s45_s19, %s387_s28  ;;  %p393_p7 = scmp.lt.s32.totalorder %s387_s28, %s387_s28 }
  0x2d   :  { %p394_p8 = por %p393_p7, %p392_p6 }
  0x2f   :  { %p395_p9 = pnand %p394_p8, %p388_p5 }
  0x31   :  { %398 = shalt.err (!%p395_p9)
}
  0x32   :  { %50 = dma.hbm_to_vmem [thread:$0]  %s545_s3, 512, %s45_s19, [#allocation6], %s429_s30, %s429_s30, %s430_s6  }
  0x33   :  { %421 = dma.done.wait [#allocation3], 256  }
  0x34   :  { %422 = vsyncadd [#allocation3], 4294967040 }
  0x35   :  { %423 = dma.done.wait [#allocation6], 1024  }
  0x36   :  { %424 = vsyncadd [#allocation6], 4294966272  ;;  %vm75_vm0 = vcmask 261120   ;;  %v64_v0 = vld [vmem:[#allocation5] sm:$0xff]  ;;  %v65_v1 = vld [vmem:[#allocation5 + $0x8] sm:$0xff]  ;;  %s432_s9 = smov [#allocation8]  }
  0x37   :  { %v66_v2 = vld [vmem:[#allocation5 + $0x10] sm:$0xff]  ;;  %v311_v3 = vpack.c.bf16 %v65_v1, %v64_v0  ;;  %v67_v4 = vld [vmem:[#allocation5 + $0x18] sm:$0xff]  ;;  %v159_v7 = vld [vmem:[#allocation7] sm:$0xff]  ;;  %s258_s10 = sshll.u32 %s432_s9, 4  ;;  %s259_s10 = int_to_ptr.vmem [resolvable:$true] %s258_s10 }
  0x38   :  { %v62_v5 = vld [vmem:[#allocation2] sm:$0xff]  ;;  %v315_v6 = vpack.c.bf16 %v67_v4, %v66_v2  ;;  %v160_v8 = vld [vmem:[#allocation7 + $0x8] sm:$0xff]  ;;  %v63_v10 = vld [vmem:[#allocation2 + $0x8] sm:$0xff]  ;;  %p404_p11 = scmp.lt.s32.totalorder %s259_s10, %s259_s10 }
  0x39   :  { %297 = vmatprep.mubr.msk.f32.mxu0 %vm75_vm0, %v62_v5  ;;  %312 = vmatprep.subr.bf16.mxu0 %v311_v3  ;;  %v319_v9 = vpack.c.bf16 %v160_v8, %v159_v7  ;;  %v161_v11 = vld [vmem:[#allocation7 + $0x10] sm:$0xff]  ;;  %v162_v12 = vld [vmem:[#allocation7 + $0x18] sm:$0xff] }
  0x3a   :  { %314 = vmatpush3.bf16.msra.mxu0 %v311_v3  ;;  %v323_v13 = vpack.c.bf16 %v162_v12, %v161_v11  ;;  %v271_v14 = vld [vmem:[%s544_s2] ss:$0 sm:$0xff]  ;;  %s399_s2 = scalar_lea.vmem %s259_s10, 256 }
  0x3b   :  { %316 = vmatprep.subr.bf16.mxu0 %v315_v6  ;;  %320 = vmatprep.subr.bf16.mxu1 %v319_v9  ;;  %v274_v21 = vld [vmem:[%s546_s4] ss:$0 sm:$0xff]  ;;  %p400_p10 = scmp.ne.s32.totalorder %s259_s10, %s399_s2  ;;  %p405_p12 = scmp.lt.s32.totalorder %s399_s2, %s399_s2 }
  0x3c   :  { %322 = vmatpush3.bf16.msra.mxu1 %v319_v9 }
  0x3d   :  { %324 = vmatprep.subr.bf16.mxu1 %v323_v13  ;;  %p406_p13 = por %p405_p12, %p404_p11 }
  0x3e   :  { %318 = vmatpush3.bf16.msra.mxu0 %v315_v6 }
  0x3f   :  { %p407_p0 = pnand %p406_p13, %p400_p10 }
  0x40   :  { %326 = vmatpush3.bf16.msra.mxu1 %v323_v13 }
  0x41   :  { %298 = vmatmul.mubr.msk.f32.vlgmr.msra.gmra.mrb[0].mxu0 %vm75_vm0, %v63_v10 }
 0x114   :  { %v299_v15 = vpop.f32.mrb[0].mxu0 }
 0x115   :  { %v154_v16 = vadd.f32 %v299_v15, %v271_v14  ;;  %v148_v17 = vpop.f32.mrb[1].mxu0 }
 0x116   :  { %v149_v18 = vadd.f32 %v271_v14, %v148_v17 }
 0x117   :  { %v158_v20 = vmax.f32 %v154_v16, 0.0 }
 0x118   :  { %v157_v19 = vmax.f32 %v149_v18, 0.0 }
 0x11a   :  { %308 = vmatprep.mubr.msk.f32.mxu1 %vm75_vm0, %v157_v19 }
 0x11b   :  { %309 = vmatmul.mubr.msk.f32.vlgmr.msra.gmra.mrb[0].mxu1 %vm75_vm0, %v158_v20 }
 0x1ee   :  { %v310_v22 = vpop.f32.mrb[0].mxu1 }
 0x1ef   :  { %v248_v23 = vadd.f32 %v310_v22, %v274_v21  ;;  %v242_v24 = vpop.f32.mrb[1].mxu1 }
 0x1f0   :  { %v243_v25 = vadd.f32 %v274_v21, %v242_v24 }
 0x1f1   :  { %252 = vst.msk [vmem:[#allocation8 + $0x8] sm:$0xff] %vm75_vm0, %v248_v23 }
 0x1f2   :  { %251 = vst.msk [vmem:[#allocation8] sm:$0xff] %vm75_vm0, %v243_v25 }
 0x1f3   :  { %410 = shalt.err (!%p407_p0)
}
 0x1f4   :  { %s411_s12 = scalar_lea.hbm %s547_s5, 256 }
 0x1f5   :  { %p412_p1 = scmp.ne.s32.totalorder %s547_s5, %s411_s12  ;;  %p415_p2 = scmp.lt.u32.totalorder %s411_s12, %s547_s5 }
 0x1f7   :  { %p417_p3 = pnand %p415_p2, %p412_p1 }
 0x1f9   :  { %420 = shalt.err (!%p417_p3)
}
 0x1fa   :  { %264 = dma.vmem_to_hbm [thread:$0]  %s259_s10, 256, %s547_s5, [#allocation4], %s429_s30, %s429_s30, %s430_s6  }
 0x1fb   :  { %425 = dma.done.wait [#allocation4], 256  }
 0x1fc   :  { %426 = vsyncadd [#allocation4], 4294967040 }
 0x1fd   :  { %268 = vsyncpa [#allocation3], 1 }
 0x1fe   :  { %269 = vsyncpa [#allocation6], 1 }
 0x1ff   :  { %270 = vsyncpa [#allocation4], 1 }

</bundles_post_ra>
